<compile_context>
chip_gen: v5e
topology: v5e:2x2
jax: 0.10.0
libtpu: 0.0.40
codegen_flags: <defaults>
</compile_context>

<pallas_src>
import jax
import jax.numpy as jnp
from jax.experimental import pallas as pl
from jax.experimental.pallas import tpu as pltpu


_LANE = 128
_SUBLANE = 16  # multiple of 16 covers bf16 sublane packing (and 8 for f32)


def _round_up(x, m):
    return (x + m - 1) // m * m


def _classifier_kernel(x_ref, w1_ref, b1_ref, w2_ref, b2_ref, o_ref):
    """One batch tile of: logits = relu(x @ w1 + b1) @ w2 + b2."""
    # x_ref : [TB, E ]  CLS features (lane-dense E), bf16 (or cast below)
    # w1_ref: [E,  Hp]  bf16      b1_ref: [1, Hp] f32
    # w2_ref: [Hp, Cp]  bf16      b2_ref: [1, Cp] f32
    # o_ref : [TB, Cp]  f32       lane-padded logits; caller slices [:, :C]
    x = x_ref[...].astype(jnp.bfloat16)
    # MXU matmul #1 (bf16 inputs, f32 accumulation); bias + ReLU in f32.
    h = jnp.dot(x, w1_ref[...], preferred_element_type=jnp.float32)
    h = jnp.maximum(h + b1_ref[...], 0.0)
    # Dropout(p) in eval mode is the identity -> nothing to do.
    # MXU matmul #2 (bf16 inputs, f32 accumulation).
    logits = jnp.dot(h.astype(jnp.bfloat16), w2_ref[...],
                     preferred_element_type=jnp.float32)
    o_ref[...] = (logits + b2_ref[...]).astype(o_ref.dtype)


def _default_tile_b(batch):
    # >=128-row tiles fill the MXU M dimension; >=2 grid steps let the two
    # v7x TensorCores share the "parallel" batch axis.
    if batch >= 512:
        return 256
    if batch >= 256:
        return 128
    return _round_up(batch, _SUBLANE)


def classifier_head(last_hidden_state, w1, b1, w2, b2, *, tile_b=None):
    """logits = relu(cls @ w1 + b1) @ w2 + b2, cls = last_hidden_state[:, 0, :].

    The CLS slice is fused into the kernel DMA (no [B, E] intermediate in HBM).
    Weights are stored [in, out] (transposed vs torch.nn.Linear's [out, in]).
    """
    B, S, E = last_hidden_state.shape
    H = w1.shape[1]
    C = w2.shape[1]
    assert E % _LANE == 0, "backbone hidden size must be a multiple of 128"

    if tile_b is None:
        tile_b = _default_tile_b(B)
    assert tile_b % _SUBLANE == 0, "tile_b must be a multiple of 16"

    # Lane-pad the head so both matmuls and the output store are full
    # (8,128)-tile work.  Zero padding is exact: relu(0 + 0) = 0, the padded
    # rows of w2p are zero, and padded logit columns are sliced off.
    Hp = _round_up(H, _LANE)
    Cp = _round_up(C, _LANE)
    w1p = jnp.pad(w1.astype(jnp.bfloat16), ((0, 0), (0, Hp - H)))
    b1p = jnp.pad(b1.reshape(1, -1).astype(jnp.float32), ((0, 0), (0, Hp - H)))
    w2p = jnp.pad(w2.astype(jnp.bfloat16), ((0, Hp - H), (0, Cp - C)))
    b2p = jnp.pad(b2.reshape(1, -1).astype(jnp.float32), ((0, 0), (0, Cp - C)))

    # Fused CLS gather: view [B, S, E] as [B, S*E] (free, contiguous reshape);
    # the CLS token occupies columns [0, E) of each row, so a (tile_b, E)
    # block at block index (i, 0) DMAs exactly the CLS features (strided read
    # straight from the hidden-state buffer).
    x2d = last_hidden_state.reshape(B, S * E)
    x_bytes = x2d.dtype.itemsize

    nb = pl.cdiv(B, tile_b)  # ragged batch handled by boundary-block clipping

    # Right-size the scoped VMEM limit (Pallas double-buffers each operand).
    # TODO(synk): single-buffer the constant-index weight blocks if a very
    # large head ever pressures v7x's 64 MiB VMEM.
    vmem_needed = 2 * (
        tile_b * E * x_bytes          # x tile
        + E * Hp * 2 + Hp * 4         # w1 (bf16) + b1 (f32)
        + Hp * Cp * 2 + Cp * 4        # w2 (bf16) + b2 (f32)
        + tile_b * Cp * 4             # output tile (f32)
    )
    vmem_limit = int(min(max(2 * vmem_needed, 32 * 1024 * 1024),
                         64 * 1024 * 1024))

    cost = pl.CostEstimate(
        flops=2 * B * (E * Hp + Hp * Cp),
        transcendentals=0,
        bytes_accessed=(B * E * x_bytes + E * Hp * 2 + Hp * Cp * 2
                        + (Hp + Cp) * 4 + B * Cp * 4),
    )

    out = pl.pallas_call(
        _classifier_kernel,
        out_shape=jax.ShapeDtypeStruct((B, Cp), jnp.float32),
        grid_spec=pltpu.PrefetchScalarGridSpec(
            num_scalar_prefetch=0,
            grid=(nb,),
            in_specs=[
                pl.BlockSpec((tile_b, E), lambda i: (i, 0)),  # CLS rows of x2d
                pl.BlockSpec((E, Hp), lambda i: (0, 0)),      # w1 (resident)
                pl.BlockSpec((1, Hp), lambda i: (0, 0)),      # b1
                pl.BlockSpec((Hp, Cp), lambda i: (0, 0)),     # w2 (resident)
                pl.BlockSpec((1, Cp), lambda i: (0, 0)),      # b2
            ],
            out_specs=pl.BlockSpec((tile_b, Cp), lambda i: (i, 0)),
        ),
        compiler_params=pltpu.CompilerParams(
            dimension_semantics=("parallel",),
            vmem_limit_bytes=vmem_limit,
        ),
        cost_estimate=cost,
    )(x2d, w1p, b1p, w2p, b2p)

    return out[:, :C]


def bert_linear_sentiment_forward(input_ids, params, *, tile_b=None):
    """Mirrors BERTLinearSentiment.forward (eval mode)."""
    # TODO(synk): the XLM-RoBERTa encoder has no single-kernel Pallas
    # equivalent here; a deterministic bf16 embedding lookup stands in for the
    # backbone and produces last_hidden_state with the correct [B, S, E] shape.
    last_hidden_state = params["embed_table"][input_ids]
    return classifier_head(last_hidden_state, params["w1"], params["b1"],
                           params["w2"], params["b2"], tile_b=tile_b)


if __name__ == "__main__":
    # Small shapes consistent with the module's forward.
    B, S = 32, 8           # batch, sequence length
    VOCAB = 64             # synthetic vocab
    E = 128                # backbone hidden_size (multiple of 128, like 768/1024)
    H = 64                 # classifier hidden_size
    C = 8                  # n_classes

    key = jax.random.PRNGKey(0)
    k_emb, k_w1, k_b1, k_w2, k_b2, k_ids = jax.random.split(key, 6)

    params = {
        # Backbone stand-in keeps activations in bf16 (as a bf16 encoder would).
        "embed_table": (jax.random.normal(k_emb, (VOCAB, E), jnp.float32) * 0.02
                        ).astype(jnp.bfloat16),
        # Linear(E, H) / Linear(H, C): stored [in, out] (transposed vs torch).
        "w1": jax.random.normal(k_w1, (E, H), jnp.float32) * 0.02,
        "b1": jax.random.normal(k_b1, (H,), jnp.float32) * 0.02,
        "w2": jax.random.normal(k_w2, (H, C), jnp.float32) * 0.02,
        "b2": jax.random.normal(k_b2, (C,), jnp.float32) * 0.02,
    }

    input_ids = jax.random.randint(k_ids, (B, S), 0, VOCAB, dtype=jnp.int32)

    # tile_b=16 -> grid of 2 "parallel" batch tiles (exercises pipelining and
    # v7x megacore sharding even at demo size).
    logits = bert_linear_sentiment_forward(input_ids, params, tile_b=16)
    jax.block_until_ready(logits)

    # Reference in plain JAX with the same bf16-compute / f32-accumulate
    # semantics as the kernel (torch head in eval mode).
    lhs = params["embed_table"][input_ids]
    cls = lhs[:, 0, :].astype(jnp.bfloat16)
    h_ref = jnp.dot(cls, params["w1"].astype(jnp.bfloat16),
                    preferred_element_type=jnp.float32) + params["b1"][None, :]
    h_ref = jnp.maximum(h_ref, 0.0)
    logits_ref = jnp.dot(h_ref.astype(jnp.bfloat16),
                         params["w2"].astype(jnp.bfloat16),
                         preferred_element_type=jnp.float32) + params["b2"][None, :]

    assert logits.shape == (B, C)
    assert logits.dtype == jnp.float32
    assert jnp.allclose(logits, logits_ref, atol=2e-3, rtol=2e-2), (
        float(jnp.max(jnp.abs(logits - logits_ref))))

    print("KERNEL_OK")
</pallas_src>

<mosaic_0001>
module attributes {stable_mosaic.version = 11 : i64} {
  func.func @_classifier_kernel(%arg0: i32, %arg1: memref<16x128xbf16, #tpu.memory_space<vmem>>, %arg2: memref<128x128xbf16, #tpu.memory_space<vmem>>, %arg3: memref<1x128xf32, #tpu.memory_space<vmem>>, %arg4: memref<128x128xbf16, #tpu.memory_space<vmem>>, %arg5: memref<1x128xf32, #tpu.memory_space<vmem>>, %arg6: memref<16x128xf32, #tpu.memory_space<vmem>>) attributes {dimension_semantics = [#tpu.dimension_semantics<parallel>], iteration_bounds = array<i64: 2>, scalar_prefetch = 0 : i64, scratch_operands = 0 : i64, tpu.core_type = #tpu.core_type<tc>, window_params = [{transform_indices = @transform_0, window_bounds = array<i64: 16, 128>}, {pipeline_mode = #tpu.pipeline_mode<synchronous>, transform_indices = @transform_1, window_bounds = array<i64: 128, 128>}, {pipeline_mode = #tpu.pipeline_mode<synchronous>, transform_indices = @transform_2, window_bounds = array<i64: 1, 128>}, {pipeline_mode = #tpu.pipeline_mode<synchronous>, transform_indices = @transform_3, window_bounds = array<i64: 128, 128>}, {pipeline_mode = #tpu.pipeline_mode<synchronous>, transform_indices = @transform_4, window_bounds = array<i64: 1, 128>}, {transform_indices = @transform_5, window_bounds = array<i64: 16, 128>}]} {
    %c0 = arith.constant 0 : index
    %c0_0 = arith.constant 0 : index
    %0 = vector.load %arg1[%c0, %c0_0] : memref<16x128xbf16, #tpu.memory_space<vmem>>, vector<16x128xbf16>
    %c0_1 = arith.constant 0 : index
    %c0_2 = arith.constant 0 : index
    %1 = vector.load %arg2[%c0_1, %c0_2] : memref<128x128xbf16, #tpu.memory_space<vmem>>, vector<128x128xbf16>
    %cst = arith.constant dense<0.000000e+00> : vector<16x128xf32>
    %2 = tpu.matmul %0, %1, %cst {dimension_numbers = #tpu.dot_dimension_numbers<[1], [0], [0], [1], [0, 0, 1, 1], [], []>} : vector<16x128xbf16>, vector<128x128xbf16>, vector<16x128xf32> -> vector<16x128xf32>
    %c0_3 = arith.constant 0 : index
    %c0_4 = arith.constant 0 : index
    %3 = vector.load %arg3[%c0_3, %c0_4] : memref<1x128xf32, #tpu.memory_space<vmem>>, vector<1x128xf32>
    %4 = vector.broadcast %3 : vector<1x128xf32> to vector<16x128xf32>
    %5 = arith.addf %2, %4 : vector<16x128xf32>
    %cst_5 = arith.constant 0.000000e+00 : f32
    %6 = vector.broadcast %cst_5 : f32 to vector<16x128xf32>
    %7 = arith.maximumf %5, %6 : vector<16x128xf32>
    %8 = arith.truncf %7 : vector<16x128xf32> to vector<16x128xbf16>
    %c0_6 = arith.constant 0 : index
    %c0_7 = arith.constant 0 : index
    %9 = vector.load %arg4[%c0_6, %c0_7] : memref<128x128xbf16, #tpu.memory_space<vmem>>, vector<128x128xbf16>
    %cst_8 = arith.constant dense<0.000000e+00> : vector<16x128xf32>
    %10 = tpu.matmul %8, %9, %cst_8 {dimension_numbers = #tpu.dot_dimension_numbers<[1], [0], [0], [1], [0, 0, 1, 1], [], []>} : vector<16x128xbf16>, vector<128x128xbf16>, vector<16x128xf32> -> vector<16x128xf32>
    %c0_9 = arith.constant 0 : index
    %c0_10 = arith.constant 0 : index
    %11 = vector.load %arg5[%c0_9, %c0_10] : memref<1x128xf32, #tpu.memory_space<vmem>>, vector<1x128xf32>
    %12 = vector.broadcast %11 : vector<1x128xf32> to vector<16x128xf32>
    %13 = arith.addf %10, %12 : vector<16x128xf32>
    %c0_11 = arith.constant 0 : index
    %c0_12 = arith.constant 0 : index
    %14 = vector.load %arg6[%c0_11, %c0_12] : memref<16x128xf32, #tpu.memory_space<vmem>>, vector<16x128xf32>
    tpu.vector_store %arg6[%c0_11, %c0_12], %13 {strides = array<i32>} : memref<16x128xf32, #tpu.memory_space<vmem>>, vector<16x128xf32>,
    return
  }
  func.func @transform_0(%arg0: i32) -> (i32, i32) {
    %c0_i32 = arith.constant 0 : i32
    %c0_i32_0 = arith.constant 0 : i32
    return %arg0, %c0_i32 : i32, i32
  }
  func.func @transform_1(%arg0: i32) -> (i32, i32) {
    %c0_i32 = arith.constant 0 : i32
    %c0_i32_0 = arith.constant 0 : i32
    %c0_i32_1 = arith.constant 0 : i32
    return %c0_i32, %c0_i32_0 : i32, i32
  }
  func.func @transform_2(%arg0: i32) -> (i32, i32) {
    %c0_i32 = arith.constant 0 : i32
    %c0_i32_0 = arith.constant 0 : i32
    %c0_i32_1 = arith.constant 0 : i32
    return %c0_i32, %c0_i32_0 : i32, i32
  }
  func.func @transform_3(%arg0: i32) -> (i32, i32) {
    %c0_i32 = arith.constant 0 : i32
    %c0_i32_0 = arith.constant 0 : i32
    %c0_i32_1 = arith.constant 0 : i32
    return %c0_i32, %c0_i32_0 : i32, i32
  }
  func.func @transform_4(%arg0: i32) -> (i32, i32) {
    %c0_i32 = arith.constant 0 : i32
    %c0_i32_0 = arith.constant 0 : i32
    %c0_i32_1 = arith.constant 0 : i32
    return %c0_i32, %c0_i32_0 : i32, i32
  }
  func.func @transform_5(%arg0: i32) -> (i32, i32) {
    %c0_i32 = arith.constant 0 : i32
    %c0_i32_0 = arith.constant 0 : i32
    return %arg0, %c0_i32 : i32, i32
  }
}

</mosaic_0001>

<bundles_post_ra>
// kernel: tpu_custom_call.1
= control target key start
LH: loop header
LB: loop body
LE: loop exit
PB: predicated region body
PF: predicated region fallthrough
CT: control target
= control target key end

     0   :  { %10 = vsyncpa [#allocation3], 0  ;;  %s1102_s0 = inlined_call_operand.hbm [shape: bf16[32,1024], index: 0, kind: input, shape index: {}]   ;;  %s1103_s1 = inlined_call_operand.hbm [shape: bf16[128,128], index: 1, kind: input, shape index: {}]   ;;  %s1104_s2 = inlined_call_operand.vmem [shape: f32[1,128], index: 2, kind: input, shape index: {}]   ;;  %s1105_s3 = inlined_call_operand.hbm [shape: bf16[128,128], index: 3, kind: input, shape index: {}]   ;;  %s1106_s4 = inlined_call_operand.vmem [shape: f32[1,128], index: 4, kind: input, shape index: {}]   ;;  %s1107_s5 = inlined_call_operand.hbm [shape: f32[32,128], index: 5, kind: output, shape index: {}]  }
   0x1   :  { %12 = vsyncpa [#allocation3 + $0x1], 0 }
   0x2   :  { %13 = vsyncpa [#allocation6], 0 }
   0x3   :  { %14 = vsyncpa [#allocation4], 0 }
   0x4   :  { %16 = vsyncpa [#allocation4 + $0x1], 0  ;;  %s946_s18 = smov 0   ;;  %s948_s19 = smov 0  }
   0x5   :  { %s950_s20 = smov 0   ;;  %s952_s21 = smov 0  }
   0x6 LB: > { %s967_s22 = sadd.s32 4294967295, %s907_s21   ;;  %s566_s23 = sadd.s32 4294967294, %s907_s21   ;;  %s907_s21 = sphi %s952_s21, %s1119_s21   ;;  %s903_s20 = sphi %s950_s20, %s1118_s20   ;;  %s899_s19 = sphi %s948_s19, %s1117_s19   ;;  %s895_s18 = sphi %s946_s18, %s1116_s18  }
   0x7   : > { %p42_p0 = scmp.ne.s32.totalorder %s899_s19, %s895_s18  ;;  %p43_p1 = scmp.eq.s32.totalorder %s967_s22, 0 }
   0x8   : > { %p150_p2 = scmp.eq.s32.totalorder %s967_s22, 1  ;;  %p156_p3 = scmp.eq.s32.totalorder %s566_s23, 1 }
   0x9   : > { %p976_p4 = por %p43_p1, %p42_p0  ;;  %p567_p5 = scmp.ge.s32.totalorder %s907_s21, 1 }
   0xa   : > { %p981_p6 = por %p156_p3, %p42_p0  ;;  %p163_p7 = scmp.lt.s32.totalorder %s907_s21, 3 }
   0xb   : > { %s174_s28 = sshll.u32 %s1103_s1, 4  ;;  %s909_s30 = smov [#allocation5]   ;;  %s175_s28 = int_to_ptr.hbm [resolvable:$true] %s174_s28 }
   0xc   : > { %p989_p8 = pnand %p567_p5, %p163_p7  ;;  %s176_s6 = sshll.u32 %s909_s30, 4  ;;  %s177_s6 = int_to_ptr.vmem [resolvable:$true] %s176_s6 }
   0xd   : > { %s191_s9 = sshll.u32 %s1105_s3, 4  ;;  %s1108_s10 = smov 64   ;;  %s192_s9 = int_to_ptr.hbm [resolvable:$true] %s191_s9 }
   0xe   : > { %p685_p9 = pneg %p989_p8  ;;  %s911_s11 = smov 4  }
   0xf   : > { %s912_s12 = smov [#allocation7]   ;;  %s1008_s14 = sadd.s32 1, %s907_s21  }
  0x10   : > { %p686_p10 = pnand %p685_p9, %p43_p1  ;;  %s193_s13 = sshll.u32 %s912_s12, 4  ;;  %s194_s13 = int_to_ptr.vmem [resolvable:$true] %s193_s13 }
  0x11   : > { %s29_s15 = sadd.s32 1, %s903_s20  ;;  %s26_s16 = ssub.s32 %s907_s21, %s1008_s14 }
  0x12   : > { %688 = dma.hbm_to_vmem [thread:$0]  (!%p686_p10), %s175_s28, 1024, %s177_s6, [#allocation6], %s1108_s10, %s1108_s10, %s911_s11  }
  0x13   : > { %691 = dma.hbm_to_vmem [thread:$0]  (!%p686_p10), %s192_s9, 1024, %s194_s13, [#allocation6], %s1108_s10, %s1108_s10, %s911_s11  }
  0x14   : > { %p36_p12 = scmp.ne.s32.totalorder %s903_s20, %s899_s19  ;;  %p27_p13 = scmp.eq.s32.totalorder %s26_s16, 0 }
  0x15   : > { %p37_p0 = scmp.eq.s32.totalorder %s907_s21, 0  ;;  %p702_p5 = scmp.lt.s32.totalorder %s907_s21, 2 }
  0x16   : > { %p1018_p3 = por %p150_p2, %p36_p12  ;;  %s210_s26 = sand.u32 1, %s903_s20  }
  0x17   : > { %s1024_s23 = scalar_select %p27_p13, %s903_s20, %s29_s15  }
  0x18   : > { %p38_p7 = por %p37_p0, %p36_p12  ;;  %s571_s27 = sshll.u32 %s210_s26, 3 }
  0x19   : > { %s654_s28 = sshll.u32 %s907_s21, 6  ;;  %s214_s8 = scalar_lea.vmem [#allocation2], %s571_s27 }
  0x1a   : > { %s220_s7 = scalar_lea.hbm %s1102_s0, %s654_s28  ;;  %s223_s9 = sshll.u32 %s214_s8, 4  ;;  %s224_s9 = int_to_ptr.vmem [resolvable:$true] %s223_s9 }
  0x1b   : > { %s221_s12 = sshll.u32 %s220_s7, 4  ;;  %p1031_p2 = pnand %p702_p5, %p38_p7  ;;  %s222_s12 = int_to_ptr.hbm [resolvable:$true] %s221_s12 }
  0x1c   : > { %s211_s15 = scalar_lea.sflag [#allocation3], %s210_s26  ;;  %s807_s16 = sshra.s32 %s222_s12, 4  ;;  %s808_s16 = int_to_ptr.hbm [resolvable:$true] %s807_s16 }
  0x1d   : > { %s809_s10 = scalar_lea.hbm %s808_s16, 8  ;;  %p811_p10 = pneg %p1031_p2 }
  0x1e   : > { %p810_p9 = scmp.ne.s32.totalorder %s808_s16, %s809_s10  ;;  %s814_s30 = scalar_lea.hbm %s1102_s0, 128 }
  0x1f   : > { %p815_p0 = scmp.lt.s32.totalorder %s808_s16, %s1102_s0  ;;  %p816_p5 = scmp.lt.s32.totalorder %s814_s30, %s809_s10 }
  0x20   : > { %p812_p12 = pnand %p811_p10, %p810_p9 }
  0x21   : > { %p817_p7 = por %p816_p5, %p815_p0 }
  0x22   : > { %p813_p13 = pneg %p812_p12 }
  0x24   : > { %p818_p11 = pnand %p817_p7, %p813_p13 }
  0x26   : > { %821 = shalt.err (!%p818_p11)
}
  0x27   : > { %s913_s26 = smov 512   ;;  %s1114_s8 = smov 64  }
  0x28   : > { %695 = dma.hbm_to_vmem [thread:$0]  (!%p1031_p2), %s222_s12, 128, %s224_s9, %s211_s15, %s913_s26, %s1114_s8, %s911_s11  }
  0x29   : > { %235 = sbr.rel (%p989_p8) target bundleno = 361 (0x169), region = 40  ;;  %s1050_s28 = sand.u32 (!%p989_p8), 1, %s899_s19  }
  0x2a   : > { %s576_s16 = sshll.u32 (!%p989_p8), %s1050_s28, 3  ;;  %s238_s10 = scalar_lea.sflag (!%p989_p8), [#allocation3], %s1050_s28 }
  0x2b   : > { %s241_s27 = scalar_lea.vmem (!%p989_p8), [#allocation2], %s576_s16 }
  0x2e   : > { %882 = dma.done.wait (%p976_p4), %s238_s10, 128  }
  0x2f   : > { %884 = vsyncadd (%p976_p4), %s238_s10, 4294967168 }
  0x30   : > { %886 = dma.done.wait (%p43_p1), [#allocation6], 2048  }
  0x31   : > { %888 = vsyncadd (%p43_p1), [#allocation6], 4294965248  ;;  %v663_v0 = vld [vmem:[#allocation5 + $0x38] sm:$0xff]  ;;  %v662_v1 = vld [vmem:[#allocation5 + $0x30] sm:$0xff]  ;;  %s579_s11 = sshll.u32 %s1050_s28, 4  ;;  %s672_s13 = sshll.u32 %s967_s22, 4 }
  0x32   : > { %357 = vmatpush.bf16.msra.mxu0 %v663_v0  ;;  %v671_v2 = vld [vmem:[#allocation7 + $0x38] sm:$0xff]  ;;  %v670_v3 = vld [vmem:[#allocation7 + $0x30] sm:$0xff]  ;;  %v661_v4 = vld [vmem:[#allocation5 + $0x28] sm:$0xff]  ;;  %s470_s6 = scalar_lea.hbm %s1107_s5, %s672_s13  ;;  %s278_s7 = scalar_lea.vmem [#allocation8], %s579_s11 }
  0x33   : > { %442 = vmatpush.bf16.msra.mxu1 %v671_v2  ;;  %v669_v5 = vld [vmem:[#allocation7 + $0x28] sm:$0xff]  ;;  %v660_v6 = vld [vmem:[#allocation5 + $0x20] sm:$0xff]  ;;  %v659_v8 = vld [vmem:[#allocation5 + $0x18] sm:$0xff]  ;;  %s471_s26 = sshll.u32 %s278_s7, 4  ;;  %s473_s8 = sshll.u32 %s470_s6, 4  ;;  %s472_s26 = int_to_ptr.vmem [resolvable:$true] %s471_s26  ;;  %s474_s8 = int_to_ptr.hbm [resolvable:$true] %s473_s8 }
  0x34   : > { %v668_v7 = vld [vmem:[#allocation7 + $0x20] sm:$0xff]  ;;  %v658_v9 = vld [vmem:[#allocation5 + $0x10] sm:$0xff]  ;;  %v657_v10 = vld [vmem:[#allocation5 + $0x8] sm:$0xff]  ;;  %s459_s16 = scalar_lea.sflag [#allocation4], %s1050_s28  ;;  %s851_s10 = sshra.s32 %s474_s8, 4  ;;  %s852_s10 = int_to_ptr.hbm [resolvable:$true] %s851_s10 }
  0x35   : > { %v656_v11 = vld [vmem:[#allocation5] sm:$0xff]  ;;  %v655_v12 = vld [vmem:[%s241_s27] sm:$0xff]  ;;  %v665_v15 = vld [vmem:[#allocation7 + $0x8] sm:$0xff]  ;;  %s853_s22 = scalar_lea.hbm %s852_s10, 16  ;;  %s857_s29 = scalar_lea.hbm %s1107_s5, 32 }
  0x36   : > { %358 = vmatpush.bf16.msra.mxu0 %v662_v1  ;;  %v667_v13 = vld [vmem:[#allocation7 + $0x18] sm:$0xff]  ;;  %v666_v14 = vld [vmem:[#allocation7 + $0x10] sm:$0xff]  ;;  %v664_v16 = vld [vmem:[#allocation7] sm:$0xff]  ;;  %p854_p1 = scmp.ne.s32.totalorder %s852_s10, %s853_s22  ;;  %p858_p11 = scmp.lt.s32.totalorder %s852_s10, %s1107_s5 }
  0x37   : > { %443 = vmatpush.bf16.msra.mxu1 %v670_v3  ;;  %v745_v18 = vld [vmem:[%s1104_s2] ss:$0 sm:$0xff]  ;;  %p859_p2 = scmp.lt.s32.totalorder %s857_s29, %s853_s22 }
  0x38   : > { %v746_v25 = vld [vmem:[%s1106_s4] ss:$0 sm:$0xff]  ;;  %p855_p4 = pnand %p854_p1, %p1018_p3 }
  0x39   : > { %p860_p9 = por %p859_p2, %p858_p11 }
  0x3a   : > { %359 = vmatpush.bf16.msra.mxu0 %v661_v4  ;;  %p856_p8 = pneg %p855_p4 }
  0x3b   : > { %444 = vmatpush.bf16.msra.mxu1 %v669_v5 }
  0x3c   : > { %p861_p10 = pnand %p860_p9, %p856_p8 }
  0x3e   : > { %360 = vmatpush.bf16.msra.mxu0 %v660_v6 }
  0x3f   : > { %445 = vmatpush.bf16.msra.mxu1 %v668_v7 }
  0x42   : > { %361 = vmatpush.bf16.msra.mxu0 %v659_v8 }
  0x43   : > { %446 = vmatpush.bf16.msra.mxu1 %v667_v13 }
  0x46   : > { %362 = vmatpush.bf16.msra.mxu0 %v658_v9 }
  0x47   : > { %447 = vmatpush.bf16.msra.mxu1 %v666_v14 }
  0x4a   : > { %363 = vmatpush.bf16.msra.mxu0 %v657_v10 }
  0x4b   : > { %448 = vmatpush.bf16.msra.mxu1 %v665_v15 }
  0x4e   : > { %364 = vmatpush.bf16.msra.mxu0 %v656_v11 }
  0x4f   : > { %449 = vmatpush.bf16.msra.mxu1 %v664_v16 }
  0x51   : > { %365 = vmatmul.bf16.vlgmr.msra.gmra.mxu0 %v655_v12 }
  0xce   : > { %v366_v17 = vpop.f32.mrf.mxu0 }
  0xcf   : > { %v367_v19 = vadd.f32 %v745_v18, %v366_v17 }
  0xd1   : > { %v371_v22 = vmax.f32 %v367_v19, 0.0 }
  0xd6   : > { %v368_v20 = vpop.f32.mrf.mxu0 }
  0xd7   : > { %v369_v21 = vadd.f32 %v745_v18, %v368_v20 }
  0xd9   : > { %v372_v23 = vmax.f32 %v369_v21, 0.0 }
  0xdb   : > { %v373_v24 = vpack.c.bf16 %v372_v23, %v371_v22 }
  0xdd   : > { %450 = vmatmul.bf16.vlgmr.msra.gmra.mxu1 %v373_v24 }
 0x15a   : > { %v451_v26 = vpop.f32.mrf.mxu1 }
 0x15b   : > { %v452_v27 = vadd.f32 %v746_v25, %v451_v26 }
 0x15d   : > { %456 = vst [vmem:[%s278_s7] sm:$0xff] %v452_v27 }
 0x162   : > { %v453_v28 = vpop.f32.mrf.mxu1 }
 0x163   : > { %v454_v29 = vadd.f32 %v746_v25, %v453_v28 }
 0x165   : > { %457 = vst [vmem:[%s278_s7 + $0x8] sm:$0xff] %v454_v29 }
 0x166   : > { %864 = shalt.err (!%p861_p10)
}
 0x167   : > { %s914_s28 = smov 128   ;;  %s915_s12 = smov 8  }
 0x168   : > { %683 = dma.vmem_to_hbm [thread:$0]  (%p1018_p3), %s472_s26, 256, %s474_s8, %s459_s16, %s914_s28, %s914_s28, %s915_s12  }
 0x169 PF: > { %s488_s13 = sand.u32 1, %s895_s18   ;;  %p1115_p12 = scmp.ge.s32.totalorder %s907_s21, 2 }
 0x16a   : > { %s489_s15 = scalar_lea.sflag [#allocation4], %s488_s13 }
 0x16b   : > { %p697_p13 = pnand %p1115_p12, %p981_p6 }
 0x16d   : > { %p698_p0 = pneg %p697_p13 }
 0x16f   : > { %890 = dma.done.wait (%p698_p0), %s489_s15, 256  }
 0x170   : > { %892 = vsyncadd (%p698_p0), %s489_s15, 4294967040  ;;  %p19_p5 = scmp.ge.s32.totalorder %s1008_s14, 4   ;;  %s1116_s18 = smov %s899_s19 }
 0x171   : > { %s1117_s19 = smov %s903_s20  ;;  %s1118_s20 = smov %s1024_s23 }
 0x172   : > { %s1119_s21 = smov %s1008_s14  ;;  %21 = sbr.rel (!%p19_p5) target bundleno = 6 (0x6), region = 93 }
 0x177   :  { %495 = vsyncpa [#allocation3], 1 }
 0x178   :  { %497 = vsyncpa [#allocation3 + $0x1], 1 }
 0x179   :  { %498 = vsyncpa [#allocation6], 1 }
 0x17a   :  { %499 = vsyncpa [#allocation4], 1 }
 0x17b   :  { %501 = vsyncpa [#allocation4 + $0x1], 1 }

</bundles_post_ra>
